<compile_context>
chip_gen: v7x
topology: tpu7x:2x2x1
jax: 0.10.0
libtpu: 0.0.40
codegen_flags: <defaults>
</compile_context>

<pallas_src>
import jax
import jax.numpy as jnp
import numpy as np
from jax import lax
from jax.experimental import pallas as pl
from jax.experimental.pallas import tpu as pltpu


# ----------------------------- shared GRU math -----------------------------
def _gru_gates(gi, gh, h, H):
    # Gate slices are lane-tile aligned (zero cost) when H % 128 == 0.
    r = jax.nn.sigmoid(gi[:, :H] + gh[:, :H])
    z = jax.nn.sigmoid(gi[:, H:2 * H] + gh[:, H:2 * H])
    n = jnp.tanh(gi[:, 2 * H:] + r * gh[:, 2 * H:])
    return (1.0 - z) * n + z * h


# -------------------- batched linear (hoisted projections) -----------------
def _linear_kernel(x_ref, w_ref, b_ref, o_ref):
    o_ref[...] = (jnp.dot(x_ref[...], w_ref[...],
                          preferred_element_type=jnp.float32)
                  + b_ref[...]).astype(o_ref.dtype)


def linear(x, w, b):
    """One-shot (M,K)@(K,N)+b Pallas matmul, operands resident in VMEM.
    Used for the hoisted, time-invariant projections (small here; tile with a
    grid for production sizes)."""
    M = x.shape[0]
    Nout = w.shape[1]
    return pl.pallas_call(
        _linear_kernel,
        out_shape=jax.ShapeDtypeStruct((M, Nout), jnp.float32),
    )(x, w, b)


# ------------------------------ encoder kernel -----------------------------
def _encoder_rnn_kernel(gi_ref, w_hh_ref, b_hh_ref, w_key_ref,
                        enc_out_ref, pk_out_ref):
    N, B, _ = gi_ref.shape
    H = w_hh_ref.shape[0]

    def step(t, h):
        gi = gi_ref[t]                                   # hoisted input projection
        gh = jnp.dot(h, w_hh_ref[...],
                     preferred_element_type=jnp.float32) + b_hh_ref[...]
        h_new = _gru_gates(gi, gh, h, H)
        enc_out_ref[t] = h_new
        # proj_key (attention.key_layer) fused into the encoder.
        pk_out_ref[t] = jnp.dot(h_new, w_key_ref[...],
                                preferred_element_type=jnp.float32)
        return h_new

    lax.fori_loop(0, N, step, jnp.zeros((B, H), jnp.float32), unroll=True)


def encoder_forward(gi_tm, w_hh, b_hh, w_key):
    N, B, _ = gi_tm.shape
    H = w_hh.shape[0]
    return pl.pallas_call(
        _encoder_rnn_kernel,
        out_shape=(jax.ShapeDtypeStruct((N, B, H), jnp.float32),
                   jax.ShapeDtypeStruct((N, B, H), jnp.float32)),
    )(gi_tm, w_hh, b_hh, w_key)


# ------------------------------ decoder kernel ------------------------------
def _decoder_rnn_kernel(gi_emb_ref, enc_ref, pk_ref, h0_ref,
                        w_query_ref, w_energy_ref,
                        w_ih_c_ref, w_hh_ref, b_hh_ref,
                        h_out_ref):
    L, B, _ = gi_emb_ref.shape
    N = enc_ref.shape[0]
    H = w_hh_ref.shape[0]
    # Hoist the energy-vector broadcast out of the time loop.
    we_b = jnp.broadcast_to(w_energy_ref[...][None], (N, H, 1))       # (N, H, 1)

    def step(t, h):
        # --- Bahdanau (MLP) attention, query = current hidden state ---
        q = jnp.dot(h, w_query_ref[...],
                    preferred_element_type=jnp.float32)               # (B, H)
        e = jnp.tanh(pk_ref[...] + q[None, :, :])                     # (N, B, H)
        # score contraction over H as a batched MXU matmul.
        s = jnp.einsum('nbh,nhk->nbk', e, we_b,
                       preferred_element_type=jnp.float32)[:, :, 0]   # (N, B)
        a = jax.nn.softmax(s, axis=0)                                 # (N, B)
        # context: reduce over the leading (time-major) axis -> VPU adds only.
        ctx = jnp.sum(a[:, :, None] * enc_ref[...], axis=0)           # (B, H)
        # --- GRU step on cat(context, word_embedding) (split matmuls;
        #     embedding half + b_ih precomputed outside the recurrence) ---
        gi = gi_emb_ref[t] + jnp.dot(ctx, w_ih_c_ref[...],
                                     preferred_element_type=jnp.float32)
        gh = jnp.dot(h, w_hh_ref[...],
                     preferred_element_type=jnp.float32) + b_hh_ref[...]
        h_new = _gru_gates(gi, gh, h, H)
        h_out_ref[t] = h_new
        return h_new

    lax.fori_loop(0, L, step, h0_ref[...], unroll=True)


def decoder_forward(gi_emb_tm, enc_outs_tm, proj_key_tm, h0, params):
    L, B, _ = gi_emb_tm.shape
    H = params["dec_w_hh"].shape[0]
    return pl.pallas_call(
        _decoder_rnn_kernel,
        out_shape=jax.ShapeDtypeStruct((L, B, H), jnp.float32),
    )(gi_emb_tm, enc_outs_tm, proj_key_tm, h0,
      params["att_w_query"], params["att_w_energy"].reshape(H, 1),
      params["dec_w_ih"][:H], params["dec_w_hh"], params["dec_b_hh"])


# --------------------- prediction head (hoisted, parallel) ------------------
def _pred_head_kernel(h_ref, w_ref, b_ref, o_ref):
    # Dropout(p=0) is the identity.
    o_ref[...] = (jnp.dot(h_ref[...], w_ref[...],
                          preferred_element_type=jnp.float32)
                  + b_ref[...]).astype(o_ref.dtype)


def pred_head(h_all_tm, w_pred, b_pred):
    L, B, H = h_all_tm.shape
    vocab = w_pred.shape[1]
    # Lane-dense vocab tile (multiple of 128) when the vocab is large.
    if vocab % 512 == 0 and vocab > 512:
        tv = 512
    else:
        tv = vocab
    nv = vocab // tv
    return pl.pallas_call(
        _pred_head_kernel,
        out_shape=jax.ShapeDtypeStruct((L, B, vocab), jnp.float32),
        grid_spec=pltpu.PrefetchScalarGridSpec(
            num_scalar_prefetch=0,
            grid=(L, nv),
            in_specs=[
                pl.BlockSpec((None, B, H), lambda t, v: (t, 0, 0)),
                pl.BlockSpec((H, tv), lambda t, v: (0, v)),
                pl.BlockSpec((1, tv), lambda t, v: (0, v)),
            ],
            out_specs=pl.BlockSpec((None, B, tv), lambda t, v: (t, 0, v)),
        ),
        compiler_params=pltpu.CompilerParams(
            dimension_semantics=("parallel", "parallel")),
    )(h_all_tm, w_pred, b_pred)


# --------------------------- full model forward -----------------------------
def s2vt_att_forward(vid_feats, s, params, sos_id, max_len):
    """Teacher-forcing (training-mode) forward, dropout_p = 0."""
    # TODO(synk): dropout with p>0 and inference-time greedy argmax rollout
    # (s=None) are not implemented.
    B, N, V = vid_feats.shape
    H = params["enc_w_hh"].shape[0]
    E = params["embedding"].shape[1]

    # Hoisted encoder input projection: ONE (N*B, V)@(V, 3H) matmul.
    # TODO(synk): the raw-input (B,N,V)->(N,B,V) transpose and the final logits
    # transpose are the only XLA layout ops left; folding them into BlockSpecs
    # would need a size-1 second-minor block, so they stay outside the kernels.
    vid_tm = jnp.transpose(vid_feats, (1, 0, 2))                       # (N, B, V)
    gi_enc = linear(vid_tm.reshape(N * B, V), params["enc_w_ih"],
                    params["enc_b_ih"]).reshape(N, B, 3 * H)

    # Encoder GRU recurrence; proj_key emitted as a fused second output.
    enc_outs_tm, proj_key_tm = encoder_forward(
        gi_enc, params["enc_w_hh"], params["enc_b_hh"], params["att_w_key"])
    encoder_final = enc_outs_tm[N - 1]                                 # (B, H)

    # Teacher forcing tokens (prepend <sos>) + hoisted embedding projection.
    sos = jnp.full((B, 1), sos_id, dtype=jnp.int32)
    s_cat = jnp.concatenate([sos, s], axis=1)[:, :max_len]             # (B, L)
    tok_tm = jnp.transpose(s_cat, (1, 0))                              # (L, B) ints
    word_embs_tm = jnp.take(params["embedding"], tok_tm, axis=0)       # (L, B, E)
    gi_emb = linear(word_embs_tm.reshape(max_len * B, E),
                    params["dec_w_ih"][H:],
                    params["dec_b_ih"]).reshape(max_len, B, 3 * H)

    # Attention decoder recurrence (hidden states only).
    h_all_tm = decoder_forward(gi_emb, enc_outs_tm, proj_key_tm,
                               encoder_final, params)                  # (L, B, H)

    # Prediction head: one parallel-gridded matmul over all L steps.
    logits_tm = pred_head(h_all_tm, params["dec_w_pred"], params["dec_b_pred"])
    return jnp.transpose(logits_tm, (1, 0, 2))                         # (B, L, vocab)


# ------------------------------- reference ----------------------------------
def reference_forward(vid_feats, s, params, sos_id, max_len):
    B, N, _ = vid_feats.shape
    H = params["enc_w_hh"].shape[0]
    h = jnp.zeros((B, H), jnp.float32)
    enc = []
    for t in range(N):
        x = vid_feats[:, t, :]
        gi = x @ params["enc_w_ih"] + params["enc_b_ih"]
        gh = h @ params["enc_w_hh"] + params["enc_b_hh"]
        h = _gru_gates(gi, gh, h, H)
        enc.append(h)
    encoder_outs = jnp.stack(enc, axis=1)                              # (B, N, H)
    h_dec = h
    pk = (encoder_outs.reshape(B * N, H) @ params["att_w_key"]).reshape(B, N, H)
    sos = jnp.full((B, 1), sos_id, dtype=jnp.int32)
    s_cat = jnp.concatenate([sos, s], axis=1)[:, :max_len]
    logits = []
    for i in range(max_len):
        q = h_dec @ params["att_w_query"]
        energy = jnp.tanh(q[:, None, :] + pk)
        scores = jnp.sum(energy * params["att_w_energy"][None, :, :], axis=-1)
        alphas = jax.nn.softmax(scores, axis=1)
        context = jnp.sum(alphas[:, :, None] * encoder_outs, axis=1)
        w_emb = params["embedding"][s_cat[:, i]]
        x = jnp.concatenate([context, w_emb], axis=1)
        gi = x @ params["dec_w_ih"] + params["dec_b_ih"]
        gh = h_dec @ params["dec_w_hh"] + params["dec_b_hh"]
        h_dec = _gru_gates(gi, gh, h_dec, H)
        logits.append(h_dec @ params["dec_w_pred"] + params["dec_b_pred"])
    return jnp.stack(logits, axis=1)


# ------------------------------ param init ----------------------------------
def init_params(key, V, H, E, vocab):
    ks = jax.random.split(key, 14)

    def w(k, shape, scale=0.1):
        return (scale * jax.random.normal(k, shape)).astype(jnp.float32)

    return {
        "enc_w_ih": w(ks[0], (V, 3 * H)),
        "enc_w_hh": w(ks[1], (H, 3 * H)),
        "enc_b_ih": w(ks[2], (1, 3 * H), 0.01),
        "enc_b_hh": w(ks[3], (1, 3 * H), 0.01),
        "att_w_key": w(ks[4], (H, H)),
        "att_w_query": w(ks[5], (H, H)),
        "att_w_energy": w(ks[6], (1, H)),          # same shape as PyTorch (1, H)
        "embedding": w(ks[7], (vocab, E), 0.5),    # synthetic "GloVe" table
        "dec_w_ih": w(ks[8], (H + E, 3 * H)),
        "dec_w_hh": w(ks[9], (H, 3 * H)),
        "dec_b_ih": w(ks[10], (1, 3 * H), 0.01),
        "dec_b_hh": w(ks[11], (1, 3 * H), 0.01),
        "dec_w_pred": w(ks[12], (H, vocab)),
        "dec_b_pred": w(ks[13], (1, vocab), 0.01),
    }


if __name__ == "__main__":
    B, N, V, H, E, vocab, max_len = 4, 8, 16, 32, 16, 128, 6
    sos_id = 1
    key = jax.random.PRNGKey(0)
    k_param, k_vid, k_tok = jax.random.split(key, 3)
    params = init_params(k_param, V, H, E, vocab)
    vid_feats = jax.random.normal(k_vid, (B, N, V), dtype=jnp.float32)
    s = jax.random.randint(k_tok, (B, max_len), 0, vocab, dtype=jnp.int32)

    logits = s2vt_att_forward(vid_feats, s, params, sos_id, max_len)
    logits = jax.block_until_ready(logits)
    assert logits.shape == (B, max_len, vocab)

    ref = reference_forward(vid_feats, s, params, sos_id, max_len)
    np.testing.assert_allclose(np.asarray(logits), np.asarray(ref),
                               rtol=5e-3, atol=5e-3)
    print("KERNEL_OK")
</pallas_src>

<mosaic_0001>
module attributes {stable_mosaic.version = 11 : i64} {
  func.func @_linear_kernel(%arg0: memref<32x16xf32, #tpu.memory_space<vmem>>, %arg1: memref<16x96xf32, #tpu.memory_space<vmem>>, %arg2: memref<1x96xf32, #tpu.memory_space<vmem>>, %arg3: memref<32x96xf32, #tpu.memory_space<vmem>>) attributes {dimension_semantics = [], scalar_prefetch = 0 : i64, scratch_operands = 0 : i64, tpu.core_type = #tpu.core_type<tc>} {
    %c0 = arith.constant 0 : index
    %c0_0 = arith.constant 0 : index
    %0 = vector.load %arg0[%c0, %c0_0] : memref<32x16xf32, #tpu.memory_space<vmem>>, vector<32x16xf32>
    %c0_1 = arith.constant 0 : index
    %c0_2 = arith.constant 0 : index
    %1 = vector.load %arg1[%c0_1, %c0_2] : memref<16x96xf32, #tpu.memory_space<vmem>>, vector<16x96xf32>
    %cst = arith.constant dense<0.000000e+00> : vector<32x96xf32>
    %2 = tpu.matmul %0, %1, %cst {dimension_numbers = #tpu.dot_dimension_numbers<[1], [0], [0], [1], [0, 0, 1, 1], [], []>} : vector<32x16xf32>, vector<16x96xf32>, vector<32x96xf32> -> vector<32x96xf32>
    %c0_3 = arith.constant 0 : index
    %c0_4 = arith.constant 0 : index
    %3 = vector.load %arg2[%c0_3, %c0_4] : memref<1x96xf32, #tpu.memory_space<vmem>>, vector<1x96xf32>
    %4 = vector.broadcast %3 : vector<1x96xf32> to vector<32x96xf32>
    %5 = arith.addf %2, %4 : vector<32x96xf32>
    %c0_5 = arith.constant 0 : index
    %c0_6 = arith.constant 0 : index
    %6 = vector.load %arg3[%c0_5, %c0_6] : memref<32x96xf32, #tpu.memory_space<vmem>>, vector<32x96xf32>
    tpu.vector_store %arg3[%c0_5, %c0_6], %5 {strides = array<i32>} : memref<32x96xf32, #tpu.memory_space<vmem>>, vector<32x96xf32>,
    return
  }
}

</mosaic_0001>

<bundles_post_ra>
// kernel: tpu_custom_call.1
= control target key start
LH: loop header
LB: loop body
LE: loop exit
PB: predicated region body
PF: predicated region fallthrough
CT: control target
= control target key end

     0   :  { %vm28_vm0 = vcmask 130048   ;;  %s257_s0 = inlined_call_operand.vmem [shape: f32[32,16], index: 0, kind: input, shape index: {}]   ;;  %s258_s1 = inlined_call_operand.vmem [shape: f32[16,96], index: 1, kind: input, shape index: {}]   ;;  %s259_s2 = inlined_call_operand.vmem [shape: f32[1,96], index: 2, kind: input, shape index: {}]   ;;  %s260_s3 = inlined_call_operand.hbm [shape: f32[32,96], index: 3, kind: output, shape index: {}]  }
   0x1   :  { %v19_v0 = vld [vmem:[%s258_s1] sm:$0xff]  ;;  %v20_v1 = vld [vmem:[%s258_s1 + $0x8] sm:$0xff]  ;;  %v17_v4 = vld [vmem:[%s257_s0 + $0x10] sm:$0xff] }
   0x2   :  { %v15_v2 = vld [vmem:[%s257_s0] sm:$0xff]  ;;  %v168_v3 = vpack.c.bf16 %v20_v1, %v19_v0  ;;  %165 = vmatprep.mubr.msk.f32.mxu1 %vm28_vm0, %v17_v4 }
   0x3   :  { %162 = vmatprep.mubr.msk.f32.mxu0 %vm28_vm0, %v15_v2 }
   0x4   :  { %8 = vsyncpa [#allocation3], 0  ;;  %169 = vmatprep.subr.bf16.mxu0 %v168_v3  ;;  %172 = vmatprep.subr.bf16.mxu1 %v168_v3  ;;  %v16_v5 = vld [vmem:[%s257_s0 + $0x8] sm:$0xff]  ;;  %v18_v6 = vld [vmem:[%s257_s0 + $0x18] sm:$0xff]  ;;  %s201_s25 = smov [#allocation2]   ;;  %vm126_vm1 = vcmask 785408  }
   0x5   :  { %171 = vmatpush3.bf16.msra.mxu0 %v168_v3  ;;  %173 = vmatpush3.bf16.msra.mxu1 %v168_v3  ;;  %v147_v7 = vld [vmem:[%s259_s2] ss:$0 sm:$0xff]  ;;  %s136_s26 = sshll.u32 %s201_s25, 4  ;;  %s137_s26 = int_to_ptr.vmem [resolvable:$true] %s136_s26 }
   0x6   :  { %s177_s0 = scalar_lea.vmem %s137_s26, 512  ;;  %p182_p1 = scmp.lt.s32.totalorder %s137_s26, %s137_s26 }
   0x7   :  { %p178_p0 = scmp.ne.s32.totalorder %s137_s26, %s177_s0  ;;  %p183_p2 = scmp.lt.s32.totalorder %s177_s0, %s177_s0 }
   0x8   :  { %163 = vmatmul.mubr.msk.f32.vlgmr.msra.gmra.mrb[0].mxu0 %vm28_vm0, %v16_v5  ;;  %166 = vmatmul.mubr.msk.f32.vlgmr.msra.gmra.mrb[0].mxu1 %vm28_vm0, %v18_v6 }
   0x9   :  { %p184_p3 = por %p183_p2, %p182_p1 }
   0xb   :  { %p185_p4 = pnand %p184_p3, %p178_p0 }
  0xdb   :  { %v164_v8 = vpop.f32.mrb[0].mxu0  ;;  %v167_v9 = vpop.f32.mrb[0].mxu1 }
  0xdc   :  { %v113_v10 = vadd.f32 %v164_v8, %v147_v7  ;;  %v123_v11 = vadd.f32 %v167_v9, %v147_v7  ;;  %v107_v12 = vpop.f32.mrb[1].mxu0  ;;  %v117_v13 = vpop.f32.mrb[1].mxu1 }
  0xdd   :  { %v108_v14 = vadd.f32 %v147_v7, %v107_v12  ;;  %v118_v15 = vadd.f32 %v147_v7, %v117_v13 }
  0xde   :  { %128 = vst.msk [vmem:[#allocation2 + $0x8] sm:$0xff] %vm126_vm1, %v113_v10  ;;  %130 = vst.msk [vmem:[#allocation2 + $0x18] sm:$0xff] %vm126_vm1, %v123_v11 }
  0xdf   :  { %127 = vst.msk [vmem:[#allocation2] sm:$0xff] %vm126_vm1, %v108_v14  ;;  %129 = vst.msk [vmem:[#allocation2 + $0x10] sm:$0xff] %vm126_vm1, %v118_v15 }
  0xe0   :  { %188 = shalt.err (!%p185_p4)
}
  0xe1   :  { %s189_s28 = scalar_lea.hbm %s260_s3, 512 }
  0xe2   :  { %p190_p5 = scmp.ne.s32.totalorder %s260_s3, %s189_s28  ;;  %p193_p6 = scmp.lt.u32.totalorder %s189_s28, %s260_s3 }
  0xe4   :  { %p195_p7 = pnand %p193_p6, %p190_p5 }
  0xe6   :  { %198 = shalt.err (!%p195_p7)
}
  0xe7   :  { %s202_s6 = smov 128   ;;  %s203_s7 = smov 8  }
  0xe8   :  { %142 = dma.vmem_to_hbm [thread:$0]  %s137_s26, 512, %s260_s3, [#allocation3], %s202_s6, %s202_s6, %s203_s7  }
  0xe9   :  { %199 = dma.done.wait [#allocation3], 512  }
  0xea   :  { %200 = vsyncadd [#allocation3], 4294966784 }
  0xeb   :  { %146 = vsyncpa [#allocation3], 1 }

</bundles_post_ra>
